<compile_context>
chip_gen: v7x
topology: tpu7x:2x2x1
jax: 0.10.0
libtpu: 0.0.40
codegen_flags: <defaults>
</compile_context>

<pallas_src>
import functools

import jax
import jax.numpy as jnp
from jax.experimental import pallas as pl
from jax.experimental.pallas import tpu as pltpu

NEG_SLOPE = 0.01  # PyTorch nn.LeakyReLU default
BN_EPS = 1e-5     # PyTorch nn.BatchNorm1d default


def _round_up(x, m):
    return (x + m - 1) // m * m


def _pairnet_kernel(x_ref, w1_ref, b1_ref, w2_ref, b2_ref, t2_ref, o_ref):
    x = x_ref[...]                                                      # (TP, Dp)

    # Layer 1: folded (Linear * BN-scale) + LeakyReLU
    h = jnp.dot(x, w1_ref[...], preferred_element_type=jnp.float32)    # (TP, Hp)
    h = h + b1_ref[...]
    h = jnp.where(h > 0, h, NEG_SLOPE * h)

    # Layer 2: folded (Linear * BN-scale, BN1-shift folded into bias) + LeakyReLU
    h2 = jnp.dot(h, w2_ref[...], preferred_element_type=jnp.float32)   # (TP, Hp)
    h2 = h2 + b2_ref[...]
    h2 = jnp.where(h2 > 0, h2, NEG_SLOPE * h2)

    # Remaining BN2 shift (post-activation).
    o_ref[...] = h2 + t2_ref[...]


@functools.partial(jax.jit, static_argnames=("tile_p",))
def pairnet_forward(feats, pairs, ious, params, *, tile_p=512):
    """feats: (O, F) f32, pairs: (P, 2) i32, ious: (P,) f32 -> (P, H) f32."""
    # --- glue: gather + concat (matches feats[pairs]; cat along last axis) ---
    sub = feats[pairs[:, 0]]                                   # (P, F)
    obj = feats[pairs[:, 1]]                                   # (P, F)
    x = jnp.concatenate([sub, obj, ious[:, None]], axis=-1)    # (P, 2F+1)
    x = x.astype(jnp.float32)

    P, d_in = x.shape
    H = params["w1"].shape[1]

    # Lane-aligned padded dims (contraction + output lane-dense).
    d_pad = _round_up(d_in, 128)
    h_pad = _round_up(H, 128)

    # Row tile: big by default; tiny batches collapse to a single grid step.
    tp = min(tile_p, _round_up(P, 8))
    P_pad = _round_up(P, tp)

    x = jnp.pad(x, ((0, P_pad - P), (0, d_pad - d_in)))

    # --- fold BatchNorm (running stats) into the linears -------------------
    # BN(y) = y * s + t, with s = gamma * rsqrt(var + eps), t = beta - mean * s.
    s1 = params["bn1_g"] * jax.lax.rsqrt(params["bn1_var"] + BN_EPS)
    t1 = params["bn1_b"] - params["bn1_mean"] * s1
    s2 = params["bn2_g"] * jax.lax.rsqrt(params["bn2_var"] + BN_EPS)
    t2 = params["bn2_b"] - params["bn2_mean"] * s2

    # Uses LeakyReLU positive homogeneity: leaky(s*z) = s*leaky(z) for s > 0.
    #   a1   = leaky(x @ (w1*s1) + b1*s1)            == s1*leaky(x@w1+b1)
    #   out  = leaky(a1 @ (w2*s2) + (b2 + t1@w2)*s2) + t2
    w1f = params["w1"] * s1[None, :]
    b1f = params["b1"] * s1
    w2f = params["w2"] * s2[None, :]
    b2f = (params["b2"] + t1 @ params["w2"]) * s2

    # Zero-pad params to the lane-aligned shapes (keeps numerics identical;
    # padded output columns stay exactly zero and are sliced off below).
    w1f = jnp.pad(w1f, ((0, d_pad - d_in), (0, h_pad - H)))
    b1f = jnp.pad(b1f, (0, h_pad - H))[None, :]
    w2f = jnp.pad(w2f, ((0, h_pad - H), (0, h_pad - H)))
    b2f = jnp.pad(b2f, (0, h_pad - H))[None, :]
    t2p = jnp.pad(t2, (0, h_pad - H))[None, :]

    full = lambda i: (0, 0)      # weights/bias resident across all grid steps
    row = lambda i: (i, 0)       # row-tiled activations

    out = pl.pallas_call(
        _pairnet_kernel,
        out_shape=jax.ShapeDtypeStruct((P_pad, h_pad), jnp.float32),
        grid=(P_pad // tp,),
        in_specs=[
            pl.BlockSpec((tp, d_pad), row),       # x tile
            pl.BlockSpec((d_pad, h_pad), full),   # w1 (scale-folded)
            pl.BlockSpec((1, h_pad), full),       # b1 (scale-folded)
            pl.BlockSpec((h_pad, h_pad), full),   # w2 (scale-folded)
            pl.BlockSpec((1, h_pad), full),       # b2 (+ BN1 shift folded)
            pl.BlockSpec((1, h_pad), full),       # BN2 shift
        ],
        out_specs=pl.BlockSpec((tp, h_pad), row),
        compiler_params=pltpu.CompilerParams(
            dimension_semantics=("parallel",)),
    )(x, w1f, b1f, w2f, b2f, t2p)

    return out[:P, :H]


def init_params(key, feature_dim, hidden_dim):
    """Parameter init mirroring PairNet.__init__ shapes (non-trivial BN stats)."""
    d_in = 2 * feature_dim + 1
    ks = jax.random.split(key, 10)

    def kaiming(k, fan_in, shape):
        return jnp.sqrt(2.0 / fan_in) * jax.random.normal(k, shape, jnp.float32)

    def bias(k, fan_in, shape):
        bound = 1.0 / jnp.sqrt(fan_in)
        return jax.random.uniform(k, shape, jnp.float32, -bound, bound)

    return {
        # stored transposed: (in, out), so x @ w == x @ W_torch.T
        "w1": kaiming(ks[0], d_in, (d_in, hidden_dim)),
        "b1": bias(ks[1], d_in, (hidden_dim,)),
        "w2": kaiming(ks[2], hidden_dim, (hidden_dim, hidden_dim)),
        "b2": bias(ks[3], hidden_dim, (hidden_dim,)),
        # Non-trivial (positive-gamma) BatchNorm running stats to exercise folding.
        "bn1_g": jax.random.uniform(ks[4], (hidden_dim,), jnp.float32, 0.5, 1.5),
        "bn1_b": 0.1 * jax.random.normal(ks[5], (hidden_dim,), jnp.float32),
        "bn1_mean": 0.1 * jax.random.normal(ks[6], (hidden_dim,), jnp.float32),
        "bn1_var": jax.random.uniform(ks[7], (hidden_dim,), jnp.float32, 0.5, 2.0),
        "bn2_g": jax.random.uniform(ks[8], (hidden_dim,), jnp.float32, 0.5, 1.5),
        "bn2_b": 0.1 * jax.random.normal(ks[9], (hidden_dim,), jnp.float32),
        "bn2_mean": jnp.zeros((hidden_dim,), jnp.float32),
        "bn2_var": jnp.ones((hidden_dim,), jnp.float32),
    }


def reference_forward(feats, pairs, ious, params):
    """Pure-JAX reference matching the PyTorch eval-mode forward (unfused)."""
    x = jnp.concatenate(
        [feats[pairs[:, 0]], feats[pairs[:, 1]], ious[:, None]], axis=-1)

    def block(h, w, b, g, be, mean, var):
        h = h @ w + b
        h = jnp.where(h > 0, h, NEG_SLOPE * h)
        return (h - mean) * jax.lax.rsqrt(var + BN_EPS) * g + be

    h = block(x, params["w1"], params["b1"], params["bn1_g"], params["bn1_b"],
              params["bn1_mean"], params["bn1_var"])
    h = block(h, params["w2"], params["b2"], params["bn2_g"], params["bn2_b"],
              params["bn2_mean"], params["bn2_var"])
    return h


if __name__ == "__main__":
    FEATURE_DIM, HIDDEN_DIM = 32, 64
    NUM_OBJECTS = 10

    key = jax.random.PRNGKey(0)
    k_feat, k_pair, k_iou, k_param = jax.random.split(key, 4)

    feats = jax.random.normal(k_feat, (NUM_OBJECTS, FEATURE_DIM), jnp.float32)
    params = init_params(k_param, FEATURE_DIM, HIDDEN_DIM)

    # Case 1: tiny pair batch -> a single grid step covering all (padded) rows.
    P1 = 16
    pairs1 = jax.random.randint(k_pair, (P1, 2), 0, NUM_OBJECTS, jnp.int32)
    ious1 = jax.random.uniform(k_iou, (P1,), jnp.float32)
    out1 = pairnet_forward(feats, pairs1, ious1, params)
    jax.block_until_ready(out1)
    ref1 = reference_forward(feats, pairs1, ious1, params)
    assert out1.shape == (P1, HIDDEN_DIM)
    assert jnp.allclose(out1, ref1, atol=1e-4, rtol=1e-4)

    # Case 2: larger, non-divisible batch -> multiple "parallel" grid steps
    # (keeps both v7x TensorCores busy) and exercises row padding.
    P2 = 300
    kp2, ki2 = jax.random.split(jax.random.PRNGKey(1))
    pairs2 = jax.random.randint(kp2, (P2, 2), 0, NUM_OBJECTS, jnp.int32)
    ious2 = jax.random.uniform(ki2, (P2,), jnp.float32)
    out2 = pairnet_forward(feats, pairs2, ious2, params, tile_p=256)
    jax.block_until_ready(out2)
    ref2 = reference_forward(feats, pairs2, ious2, params)
    assert out2.shape == (P2, HIDDEN_DIM)
    assert jnp.allclose(out2, ref2, atol=1e-4, rtol=1e-4)

    print("KERNEL_OK")
</pallas_src>

<mosaic_0001>
module attributes {stable_mosaic.version = 11 : i64} {
  func.func @_pairnet_kernel(%arg0: i32, %arg1: memref<16x128xf32, #tpu.memory_space<vmem>>, %arg2: memref<128x128xf32, #tpu.memory_space<vmem>>, %arg3: memref<1x128xf32, #tpu.memory_space<vmem>>, %arg4: memref<128x128xf32, #tpu.memory_space<vmem>>, %arg5: memref<1x128xf32, #tpu.memory_space<vmem>>, %arg6: memref<1x128xf32, #tpu.memory_space<vmem>>, %arg7: memref<16x128xf32, #tpu.memory_space<vmem>>) attributes {dimension_semantics = [#tpu.dimension_semantics<parallel>], iteration_bounds = array<i64: 1>, scalar_prefetch = 0 : i64, scratch_operands = 0 : i64, tpu.core_type = #tpu.core_type<tc>, window_params = [{transform_indices = @transform_0, window_bounds = array<i64: 16, 128>}, {pipeline_mode = #tpu.pipeline_mode<synchronous>, transform_indices = @transform_1, window_bounds = array<i64: 128, 128>}, {pipeline_mode = #tpu.pipeline_mode<synchronous>, transform_indices = @transform_2, window_bounds = array<i64: 1, 128>}, {pipeline_mode = #tpu.pipeline_mode<synchronous>, transform_indices = @transform_3, window_bounds = array<i64: 128, 128>}, {pipeline_mode = #tpu.pipeline_mode<synchronous>, transform_indices = @transform_4, window_bounds = array<i64: 1, 128>}, {pipeline_mode = #tpu.pipeline_mode<synchronous>, transform_indices = @transform_5, window_bounds = array<i64: 1, 128>}, {transform_indices = @transform_6, window_bounds = array<i64: 16, 128>}]} {
    %c0 = arith.constant 0 : index
    %c0_0 = arith.constant 0 : index
    %0 = vector.load %arg1[%c0, %c0_0] : memref<16x128xf32, #tpu.memory_space<vmem>>, vector<16x128xf32>
    %c0_1 = arith.constant 0 : index
    %c0_2 = arith.constant 0 : index
    %1 = vector.load %arg2[%c0_1, %c0_2] : memref<128x128xf32, #tpu.memory_space<vmem>>, vector<128x128xf32>
    %cst = arith.constant dense<0.000000e+00> : vector<16x128xf32>
    %2 = tpu.matmul %0, %1, %cst {dimension_numbers = #tpu.dot_dimension_numbers<[1], [0], [0], [1], [0, 0, 1, 1], [], []>} : vector<16x128xf32>, vector<128x128xf32>, vector<16x128xf32> -> vector<16x128xf32>
    %c0_3 = arith.constant 0 : index
    %c0_4 = arith.constant 0 : index
    %3 = vector.load %arg3[%c0_3, %c0_4] : memref<1x128xf32, #tpu.memory_space<vmem>>, vector<1x128xf32>
    %4 = vector.broadcast %3 : vector<1x128xf32> to vector<16x128xf32>
    %5 = arith.addf %2, %4 : vector<16x128xf32>
    %cst_5 = arith.constant 0.000000e+00 : f32
    %6 = vector.broadcast %cst_5 : f32 to vector<16x128xf32>
    %7 = arith.cmpf ogt, %5, %6 : vector<16x128xf32>
    %cst_6 = arith.constant 0.00999999977 : f32
    %8 = vector.broadcast %cst_6 : f32 to vector<16x128xf32>
    %9 = arith.mulf %8, %5 : vector<16x128xf32>
    %10 = arith.select %7, %5, %9 : vector<16x128xi1>, vector<16x128xf32>
    %c0_7 = arith.constant 0 : index
    %c0_8 = arith.constant 0 : index
    %11 = vector.load %arg4[%c0_7, %c0_8] : memref<128x128xf32, #tpu.memory_space<vmem>>, vector<128x128xf32>
    %cst_9 = arith.constant dense<0.000000e+00> : vector<16x128xf32>
    %12 = tpu.matmul %10, %11, %cst_9 {dimension_numbers = #tpu.dot_dimension_numbers<[1], [0], [0], [1], [0, 0, 1, 1], [], []>} : vector<16x128xf32>, vector<128x128xf32>, vector<16x128xf32> -> vector<16x128xf32>
    %c0_10 = arith.constant 0 : index
    %c0_11 = arith.constant 0 : index
    %13 = vector.load %arg5[%c0_10, %c0_11] : memref<1x128xf32, #tpu.memory_space<vmem>>, vector<1x128xf32>
    %14 = vector.broadcast %13 : vector<1x128xf32> to vector<16x128xf32>
    %15 = arith.addf %12, %14 : vector<16x128xf32>
    %cst_12 = arith.constant 0.000000e+00 : f32
    %16 = vector.broadcast %cst_12 : f32 to vector<16x128xf32>
    %17 = arith.cmpf ogt, %15, %16 : vector<16x128xf32>
    %cst_13 = arith.constant 0.00999999977 : f32
    %18 = vector.broadcast %cst_13 : f32 to vector<16x128xf32>
    %19 = arith.mulf %18, %15 : vector<16x128xf32>
    %20 = arith.select %17, %15, %19 : vector<16x128xi1>, vector<16x128xf32>
    %c0_14 = arith.constant 0 : index
    %c0_15 = arith.constant 0 : index
    %21 = vector.load %arg6[%c0_14, %c0_15] : memref<1x128xf32, #tpu.memory_space<vmem>>, vector<1x128xf32>
    %22 = vector.broadcast %21 : vector<1x128xf32> to vector<16x128xf32>
    %23 = arith.addf %20, %22 : vector<16x128xf32>
    %c0_16 = arith.constant 0 : index
    %c0_17 = arith.constant 0 : index
    %24 = vector.load %arg7[%c0_16, %c0_17] : memref<16x128xf32, #tpu.memory_space<vmem>>, vector<16x128xf32>
    tpu.vector_store %arg7[%c0_16, %c0_17], %23 {strides = array<i32>} : memref<16x128xf32, #tpu.memory_space<vmem>>, vector<16x128xf32>,
    return
  }
  func.func @transform_0(%arg0: i32) -> (i32, i32) {
    %c0_i32 = arith.constant 0 : i32
    %c0_i32_0 = arith.constant 0 : i32
    return %arg0, %c0_i32 : i32, i32
  }
  func.func @transform_1(%arg0: i32) -> (i32, i32) {
    %c0_i32 = arith.constant 0 : i32
    %c0_i32_0 = arith.constant 0 : i32
    %c0_i32_1 = arith.constant 0 : i32
    return %c0_i32, %c0_i32_0 : i32, i32
  }
  func.func @transform_2(%arg0: i32) -> (i32, i32) {
    %c0_i32 = arith.constant 0 : i32
    %c0_i32_0 = arith.constant 0 : i32
    %c0_i32_1 = arith.constant 0 : i32
    return %c0_i32, %c0_i32_0 : i32, i32
  }
  func.func @transform_3(%arg0: i32) -> (i32, i32) {
    %c0_i32 = arith.constant 0 : i32
    %c0_i32_0 = arith.constant 0 : i32
    %c0_i32_1 = arith.constant 0 : i32
    return %c0_i32, %c0_i32_0 : i32, i32
  }
  func.func @transform_4(%arg0: i32) -> (i32, i32) {
    %c0_i32 = arith.constant 0 : i32
    %c0_i32_0 = arith.constant 0 : i32
    %c0_i32_1 = arith.constant 0 : i32
    return %c0_i32, %c0_i32_0 : i32, i32
  }
  func.func @transform_5(%arg0: i32) -> (i32, i32) {
    %c0_i32 = arith.constant 0 : i32
    %c0_i32_0 = arith.constant 0 : i32
    %c0_i32_1 = arith.constant 0 : i32
    return %c0_i32, %c0_i32_0 : i32, i32
  }
  func.func @transform_6(%arg0: i32) -> (i32, i32) {
    %c0_i32 = arith.constant 0 : i32
    %c0_i32_0 = arith.constant 0 : i32
    return %arg0, %c0_i32 : i32, i32
  }
}

</mosaic_0001>

<bundles_post_ra>
// kernel: mul.22
= control target key start
LH: loop header
LB: loop body
LE: loop exit
PB: predicated region body
PF: predicated region fallthrough
CT: control target
= control target key end

     0   :  { %s34_s0 = inlined_call_operand.vmem [shape: f32[64], index: 0, kind: input, shape index: {}]   ;;  %s35_s1 = inlined_call_operand.vmem [shape: f32[64], index: 1, kind: input, shape index: {}]   ;;  %s36_s2 = inlined_call_operand.vmem [shape: f32[64], index: 2, kind: output, shape index: {}]  }
   0x1   :  { %v3_v0 = vld [vmem:[%s34_s0] sm:$0x1] }
   0x2   :  { %v4_v1 = vld [vmem:[%s35_s1] sm:$0x1] }
   0x3   :  { %v7_v2 = vmul.f32 %v4_v1, %v3_v0 }
   0x5   :  { %9 = vst [vmem:[%s36_s2] sm:$0x1] %v7_v2 }

// kernel: pairnet_forward.1
= control target key start
LH: loop header
LB: loop body
LE: loop exit
PB: predicated region body
PF: predicated region fallthrough
CT: control target
= control target key end

     0   :  { %s622_s0 = inlined_call_operand.vmem [shape: f32[16,128], index: 0, kind: input, shape index: {}]   ;;  %s623_s1 = inlined_call_operand.vmem [shape: f32[128,128], index: 1, kind: input, shape index: {}]   ;;  %s624_s2 = inlined_call_operand.vmem [shape: f32[1,128], index: 2, kind: input, shape index: {}]   ;;  %s625_s3 = inlined_call_operand.vmem [shape: f32[128,128], index: 3, kind: input, shape index: {}]   ;;  %s626_s4 = inlined_call_operand.vmem [shape: f32[1,128], index: 4, kind: input, shape index: {}]   ;;  %s627_s5 = inlined_call_operand.vmem [shape: f32[1,128], index: 5, kind: input, shape index: {}]   ;;  %s628_s6 = inlined_call_operand.hbm [shape: f32[16,128], index: 6, kind: output, shape index: {}]  }
   0x1   :  { %v26_v0 = vld [vmem:[%s623_s1] sm:$0xff]  ;;  %v27_v1 = vld [vmem:[%s623_s1 + $0x8] sm:$0xff]  ;;  %v28_v2 = vld [vmem:[%s623_s1 + $0x10] sm:$0xff] }
   0x2   :  { %v370_v3 = vpack.c.bf16 %v27_v1, %v26_v0  ;;  %v29_v4 = vld [vmem:[%s623_s1 + $0x18] sm:$0xff]  ;;  %v30_v6 = vld [vmem:[%s623_s1 + $0x20] sm:$0xff]  ;;  %v31_v7 = vld [vmem:[%s623_s1 + $0x28] sm:$0xff] }
   0x3   :  { %v374_v5 = vpack.c.bf16 %v29_v4, %v28_v2  ;;  %v378_v8 = vpack.c.bf16 %v31_v7, %v30_v6  ;;  %v32_v9 = vld [vmem:[%s623_s1 + $0x30] sm:$0xff]  ;;  %v33_v10 = vld [vmem:[%s623_s1 + $0x38] sm:$0xff]  ;;  %v24_v11 = vld [vmem:[%s622_s0] sm:$0xff] }
   0x4   :  { %371 = vmatprep.subr.bf16.mxu0 %v370_v3  ;;  %332 = vmatprep.mubr.f32.mxu0 %v24_v11  ;;  %v130_v12 = vld [vmem:[%s625_s3] sm:$0xff]  ;;  %v131_v13 = vld [vmem:[%s625_s3 + $0x8] sm:$0xff]  ;;  %v132_v14 = vld [vmem:[%s625_s3 + $0x10] sm:$0xff]  ;;  %v382_v20 = vpack.c.bf16 %v33_v10, %v32_v9 }
   0x5   :  { %373 = vmatpush3.bf16.msra.mxu0 %v370_v3  ;;  %v402_v15 = vpack.c.bf16 %v131_v13, %v130_v12  ;;  %v133_v16 = vld [vmem:[%s625_s3 + $0x18] sm:$0xff]  ;;  %v134_v18 = vld [vmem:[%s625_s3 + $0x20] sm:$0xff]  ;;  %v135_v19 = vld [vmem:[%s625_s3 + $0x28] sm:$0xff] }
   0x6   :  { %375 = vmatprep.subr.bf16.mxu0 %v374_v5  ;;  %v406_v17 = vpack.c.bf16 %v133_v16, %v132_v14  ;;  %v34_v21 = vld [vmem:[%s623_s1 + $0x40] sm:$0xff]  ;;  %v35_v22 = vld [vmem:[%s623_s1 + $0x48] sm:$0xff] }
   0x7   :  { %403 = vmatprep.subr.bf16.mxu1 %v402_v15 }
   0x8   :  { %405 = vmatpush3.bf16.msra.mxu1 %v402_v15 }
   0x9   :  { %377 = vmatpush3.bf16.msra.mxu0 %v374_v5 }
   0xa   :  { %379 = vmatprep.subr.bf16.mxu0 %v378_v8 }
   0xb   :  { %11 = vsyncpa [#allocation3], 0  ;;  %407 = vmatprep.subr.bf16.mxu1 %v406_v17  ;;  %v410_v23 = vpack.c.bf16 %v135_v19, %v134_v18  ;;  %v136_v24 = vld [vmem:[%s625_s3 + $0x30] sm:$0xff]  ;;  %v137_v25 = vld [vmem:[%s625_s3 + $0x38] sm:$0xff]  ;;  %v386_v26 = vpack.c.bf16 %v35_v22, %v34_v21  ;;  %s461_s19 = smov [#allocation2]  }
   0xc   :  { %v36_v27 = vld [vmem:[%s623_s1 + $0x50] sm:$0xff]  ;;  %v37_v28 = vld [vmem:[%s623_s1 + $0x58] sm:$0xff]  ;;  %409 = vmatpush3.bf16.msra.mxu1 %v406_v17  ;;  %v414_v29 = vpack.c.bf16 %v137_v25, %v136_v24  ;;  %v138_v30 = vld [vmem:[%s625_s3 + $0x40] sm:$0xff]  ;;  %s250_s20 = sshll.u32 %s461_s19, 4  ;;  %s251_s20 = int_to_ptr.vmem [resolvable:$true] %s250_s20 }
   0xd   :  { %381 = vmatpush3.bf16.msra.mxu0 %v378_v8  ;;  %411 = vmatprep.subr.bf16.mxu1 %v410_v23  ;;  %v139_v31 = vld [vmem:[%s625_s3 + $0x48] sm:$0xff]  ;;  %v390_v32 = vpack.c.bf16 %v37_v28, %v36_v27  ;;  %v38_v33 = vld [vmem:[%s623_s1 + $0x60] sm:$0xff]  ;;  %v140_v36 = vld [vmem:[%s625_s3 + $0x50] sm:$0xff]  ;;  %p442_p1 = scmp.lt.s32.totalorder %s251_s20, %s251_s20 }
   0xe   :  { %383 = vmatprep.subr.bf16.mxu0 %v382_v20  ;;  %v39_v34 = vld [vmem:[%s623_s1 + $0x68] sm:$0xff]  ;;  %v418_v35 = vpack.c.bf16 %v139_v31, %v138_v30  ;;  %v141_v37 = vld [vmem:[%s625_s3 + $0x58] sm:$0xff]  ;;  %v40_v39 = vld [vmem:[%s623_s1 + $0x70] sm:$0xff] }
   0xf   :  { %v394_v38 = vpack.c.bf16 %v39_v34, %v38_v33  ;;  %v41_v40 = vld [vmem:[%s623_s1 + $0x78] sm:$0xff]  ;;  %v422_v41 = vpack.c.bf16 %v141_v37, %v140_v36  ;;  %v25_v43 = vld [vmem:[%s622_s0 + $0x8] sm:$0xff]  ;;  %v142_v44 = vld [vmem:[%s625_s3 + $0x60] sm:$0xff] }
  0x10   :  { %413 = vmatpush3.bf16.msra.mxu1 %v410_v23  ;;  %v398_v42 = vpack.c.bf16 %v41_v40, %v40_v39  ;;  %v143_v45 = vld [vmem:[%s625_s3 + $0x68] sm:$0xff]  ;;  %v144_v47 = vld [vmem:[%s625_s3 + $0x70] sm:$0xff]  ;;  %v145_v48 = vld [vmem:[%s625_s3 + $0x78] sm:$0xff] }
  0x11   :  { %385 = vmatpush3.bf16.msra.mxu0 %v382_v20  ;;  %415 = vmatprep.subr.bf16.mxu1 %v414_v29  ;;  %v426_v46 = vpack.c.bf16 %v143_v45, %v142_v44  ;;  %v430_v49 = vpack.c.bf16 %v145_v48, %v144_v47  ;;  %v261_v50 = vld [vmem:[%s624_s2] ss:$0 sm:$0xff] }
  0x12   :  { %387 = vmatprep.subr.bf16.mxu0 %v386_v26  ;;  %v262_v59 = vld [vmem:[%s626_s4] ss:$0 sm:$0xff]  ;;  %s437_s4 = scalar_lea.vmem %s251_s20, 256 }
  0x13   :  { %v263_v1 = vld [vmem:[%s627_s5] ss:$0 sm:$0xff]  ;;  %p438_p0 = scmp.ne.s32.totalorder %s251_s20, %s437_s4  ;;  %p443_p2 = scmp.lt.s32.totalorder %s437_s4, %s437_s4 }
  0x14   :  { %417 = vmatpush3.bf16.msra.mxu1 %v414_v29 }
  0x15   :  { %389 = vmatpush3.bf16.msra.mxu0 %v386_v26  ;;  %419 = vmatprep.subr.bf16.mxu1 %v418_v35  ;;  %p444_p3 = por %p443_p2, %p442_p1 }
  0x16   :  { %391 = vmatprep.subr.bf16.mxu0 %v390_v32 }
  0x17   :  { %p445_p4 = pnand %p444_p3, %p438_p0 }
  0x18   :  { %421 = vmatpush3.bf16.msra.mxu1 %v418_v35 }
  0x19   :  { %393 = vmatpush3.bf16.msra.mxu0 %v390_v32  ;;  %423 = vmatprep.subr.bf16.mxu1 %v422_v41 }
  0x1a   :  { %395 = vmatprep.subr.bf16.mxu0 %v394_v38 }
  0x1c   :  { %425 = vmatpush3.bf16.msra.mxu1 %v422_v41 }
  0x1d   :  { %397 = vmatpush3.bf16.msra.mxu0 %v394_v38  ;;  %427 = vmatprep.subr.bf16.mxu1 %v426_v46 }
  0x1e   :  { %399 = vmatprep.subr.bf16.mxu0 %v398_v42 }
  0x20   :  { %429 = vmatpush3.bf16.msra.mxu1 %v426_v46 }
  0x21   :  { %401 = vmatpush3.bf16.msra.mxu0 %v398_v42  ;;  %431 = vmatprep.subr.bf16.mxu1 %v430_v49 }
  0x24   :  { %333 = vmatmul.mubr.f32.vlgmr.msra.gmra.mrb[0].mxu0 %v25_v43  ;;  %433 = vmatpush3.bf16.msra.mxu1 %v430_v49 }
  0xf7   :  { %v334_v51 = vpop.f32.mrb[0].mxu0 }
  0xf8   :  { %v121_v52 = vadd.f32 %v334_v51, %v261_v50  ;;  %v115_v53 = vpop.f32.mrb[1].mxu0 }
  0xf9   :  { %v116_v54 = vadd.f32 %v261_v50, %v115_v53 }
  0xfa   :  { %v127_v55 = vmul.f32 0.01, %v121_v52  ;;  %vm125_vm1 = vcmp.gt.f32.partialorder %v121_v52, 0.0 }
  0xfb   :  { %vm124_vm0 = vcmp.gt.f32.partialorder %v116_v54, 0.0  ;;  %v126_v56 = vmul.f32 0.01, %v116_v54 }
  0xfc   :  { %v129_v58 = vsel %vm125_vm1, %v121_v52, %v127_v55 }
  0xfd   :  { %v128_v57 = vsel %vm124_vm0, %v116_v54, %v126_v56 }
  0xfe   :  { %367 = vmatprep.mubr.f32.mxu1 %v128_v57 }
  0xff   :  { %368 = vmatmul.mubr.f32.vlgmr.msra.gmra.mrb[0].mxu1 %v129_v58 }
 0x1d2   :  { %v369_v60 = vpop.f32.mrb[0].mxu1 }
 0x1d3   :  { %v225_v61 = vadd.f32 %v369_v60, %v262_v59  ;;  %v219_v62 = vpop.f32.mrb[1].mxu1 }
 0x1d4   :  { %v220_v63 = vadd.f32 %v262_v59, %v219_v62 }
 0x1d5   :  { %vm229_vm2 = vcmp.gt.f32.partialorder %v225_v61, 0.0  ;;  %v231_v0 = vmul.f32 0.01, %v225_v61 }
 0x1d6   :  { %vm228_vm3 = vcmp.gt.f32.partialorder %v220_v63, 0.0  ;;  %v230_v2 = vmul.f32 0.01, %v220_v63 }
 0x1d7   :  { %v233_v3 = vsel %vm229_vm2, %v225_v61, %v231_v0 }
 0x1d8   :  { %v242_v4 = vadd.f32 %v263_v1, %v233_v3  ;;  %v232_v5 = vsel %vm228_vm3, %v220_v63, %v230_v2 }
 0x1d9   :  { %v241_v6 = vadd.f32 %v263_v1, %v232_v5 }
 0x1da   :  { %244 = vst [vmem:[#allocation2 + $0x8] sm:$0xff] %v242_v4 }
 0x1db   :  { %243 = vst [vmem:[#allocation2] sm:$0xff] %v241_v6 }
 0x1dc   :  { %448 = shalt.err (!%p445_p4)
}
 0x1dd   :  { %s449_s22 = scalar_lea.hbm %s628_s6, 256 }
 0x1de   :  { %p450_p5 = scmp.ne.s32.totalorder %s628_s6, %s449_s22  ;;  %p453_p6 = scmp.lt.u32.totalorder %s449_s22, %s628_s6 }
 0x1e0   :  { %p455_p7 = pnand %p453_p6, %p450_p5 }
 0x1e2   :  { %458 = shalt.err (!%p455_p7)
}
 0x1e3   :  { %s462_s27 = smov 128   ;;  %s463_s28 = smov 8  }
 0x1e4   :  { %256 = dma.vmem_to_hbm [thread:$0]  %s251_s20, 256, %s628_s6, [#allocation3], %s462_s27, %s462_s27, %s463_s28  }
 0x1e5   :  { %459 = dma.done.wait [#allocation3], 256  }
 0x1e6   :  { %460 = vsyncadd [#allocation3], 4294967040 }
 0x1e7   :  { %260 = vsyncpa [#allocation3], 1 }

</bundles_post_ra>
